<compile_context>
chip_gen: v7x
topology: tpu7x:2x2x1
jax: 0.10.0
libtpu: 0.0.40
codegen_flags: <defaults>
</compile_context>

<pallas_src>
import math
import functools

import jax
import jax.numpy as jnp
from jax.experimental import pallas as pl
from jax.experimental.pallas import tpu as pltpu


# --------------------------------------------------------------------------
# kernel
# --------------------------------------------------------------------------
def _moe_gate_kernel(x_ref, wt_ref, idx_ref, w_ref, *, top_k, norm_topk_prob,
                     routed_scaling_factor, n_experts):
    # logits [tm, E] = x[tm, H] @ W^T[H, E]; native-dtype operands straight to
    # the MXU, f32 accumulate (== the module's explicit float32 gating).
    logits = jnp.dot(x_ref[...], wt_ref[...],
                     preferred_element_type=jnp.float32)          # [tm, E] f32

    col = jax.lax.broadcasted_iota(jnp.int32, logits.shape, 1)    # expert id / lane

    # Greedy top-k on raw logits (softmax is monotone -> identical selection);
    # max + lowest-index tie-break, masking the winner with -inf between steps.
    s = logits
    top_vals, top_idxs = [], []
    for _ in range(top_k):
        val = jnp.max(s, axis=-1, keepdims=True)                  # [tm, 1]
        idx = jnp.min(jnp.where(s == val, col, n_experts), axis=-1,
                      keepdims=True).astype(jnp.int32)            # [tm, 1]
        top_vals.append(val)
        top_idxs.append(idx)
        s = jnp.where(col == idx, -jnp.inf, s)

    topk_logits = jnp.concatenate(top_vals, axis=-1)              # [tm, K]
    row_max = top_vals[0]                                         # global row max

    if top_k > 1 and norm_topk_prob:
        # The global softmax denominator cancels in the renormalization, so
        # only the K selected logits need an exp.
        e = jnp.exp(topk_logits - row_max)
        wt = e / (jnp.sum(e, axis=-1, keepdims=True) + 1e-20)
    else:
        # True softmax probabilities; reuse row_max (no second full-max pass),
        # exact divide for parity with the PyTorch softmax.
        z = jnp.sum(jnp.exp(logits - row_max), axis=-1, keepdims=True)
        wt = jnp.exp(topk_logits - row_max) / z * routed_scaling_factor

    idx_ref[...] = jnp.concatenate(top_idxs, axis=-1)             # [tm, K] int32
    w_ref[...] = wt.astype(w_ref.dtype)                           # [tm, K] f32


# --------------------------------------------------------------------------
# generation-aware sizing helpers
# --------------------------------------------------------------------------
def _round_up(a, b):
    return -(-a // b) * b


def _tpu_vmem_budget():
    """Returns (default_scoped_vmem_bytes, safe_vmem_cap_bytes, two_tensorcores)."""
    kind = ""
    try:
        kind = getattr(jax.devices()[0], "device_kind", "") or ""
    except Exception:
        pass
    k = kind.lower().replace(" ", "")
    if "v7" in k or "7x" in k:
        # 64 MiB physical VMEM, 2 TensorCores per chip -> leave headroom.
        return 32 << 20, 48 << 20, True
    if "v6" in k:
        # 128 MiB physical, 32 MiB scoped default.
        return 32 << 20, 100 << 20, False
    if "v5lite" in k or "v5e" in k:
        # v5e scoped default is only 16 MiB.
        return 16 << 20, 100 << 20, False
    # Unknown / older generation: be conservative.
    return 16 << 20, 48 << 20, False


def _vmem_need_bytes(tm, h, e, x_bytes, w_bytes):
    """Rough VMEM footprint of one pipelined grid step (incl. temporaries)."""
    lane_e = max(128, _round_up(e, 128))
    x_tiles = 2 * tm * h * x_bytes          # double-buffered activation tile
    w_res = e * h * w_bytes                 # resident (single-buffered) weight
    outs = 2 * 2 * tm * 128 * 4             # idx + weight blocks (lane padded)
    temps = 6 * tm * lane_e * 4             # f32 logits / top-k masks / exp scratch
    return x_tiles + w_res + outs + temps


# --------------------------------------------------------------------------
# wrapper
# --------------------------------------------------------------------------
def moe_gate(hidden_states, weight, *, top_k, norm_topk_prob=True,
             routed_scaling_factor=1.0):
    """hidden_states: [B, S, H]; weight: [E, H] (nn.Linear-style).

    Returns (topk_idx [T, K] int32, topk_weight [T, K] f32, aux_loss=None).
    """
    bsz, seq_len, h = hidden_states.shape
    n_experts = weight.shape[0]
    t = bsz * seq_len

    x = hidden_states.reshape(t, h)   # natural [T, H] layout; no transpose / pad
    w_t = weight.T                    # tiny [H, E]; only W is pre-transposed

    x_bytes = jnp.dtype(x.dtype).itemsize
    w_bytes = jnp.dtype(weight.dtype).itemsize
    vmem_default, vmem_cap, two_tc = _tpu_vmem_budget()

    # --- token tile size ---------------------------------------------------
    if t <= 128:
        tm = t                                       # single full-dim block
    else:
        tm = 128
        for cand in (1024, 512, 256, 128):           # biggest tile that fits VMEM
            if _vmem_need_bytes(cand, h, n_experts, x_bytes, w_bytes) <= vmem_cap:
                tm = cand
                break
        tm = min(tm, _round_up(t, 128))              # no block larger than T
        if two_tc and t >= 256:
            # >= 2 grid steps so the 'parallel' token axis shards across both
            # v7x TensorCores.
            tm = min(tm, max(128, _round_up(-(-t // 2), 128)))
    grid = pl.cdiv(t, tm)                            # ragged tail -> masked block

    # --- scoped-VMEM limit (generation-aware default / cap) -----------------
    need = _vmem_need_bytes(tm, h, n_experts, x_bytes, w_bytes)
    vmem_limit = None
    if need > vmem_default:
        vmem_limit = int(min(max(need * 3 // 2, vmem_default), vmem_cap))

    # --- BlockSpecs ----------------------------------------------------------
    x_spec = pl.BlockSpec((tm, h), lambda i: (i, 0))
    if grid > 1:
        # Resident weight: block index never changes -> single buffer (saves
        # one E*H*bytes VMEM buffer; most valuable on v7x's 64 MiB).
        w_spec = pl.BlockSpec((h, n_experts), lambda i: (0, 0),
                              pipeline_mode=pl.Buffered(1))
    else:
        w_spec = pl.BlockSpec((h, n_experts), lambda i: (0, 0))

    kernel = functools.partial(
        _moe_gate_kernel, top_k=top_k, norm_topk_prob=norm_topk_prob,
        routed_scaling_factor=routed_scaling_factor, n_experts=n_experts)

    topk_idx, topk_weight = pl.pallas_call(
        kernel,
        out_shape=(jax.ShapeDtypeStruct((t, top_k), jnp.int32),
                   jax.ShapeDtypeStruct((t, top_k), jnp.float32)),
        grid_spec=pltpu.PrefetchScalarGridSpec(
            num_scalar_prefetch=0,
            grid=(grid,),
            in_specs=[x_spec, w_spec],
            out_specs=[
                pl.BlockSpec((tm, top_k), lambda i: (i, 0)),
                pl.BlockSpec((tm, top_k), lambda i: (i, 0)),
            ],
        ),
        compiler_params=pltpu.CompilerParams(
            dimension_semantics=("parallel",),       # token axis shards across TCs
            vmem_limit_bytes=vmem_limit),
    )(x, w_t)

    aux_loss = None  # eval path (self.training False) -> no aux loss
    # TODO(synk): training-time aux_loss (seq_aux scatter_add / load-balance
    # loss) and the 'group_limited_greedy' topk_method are not implemented.
    return topk_idx, topk_weight, aux_loss


# --------------------------------------------------------------------------
# reference & test
# --------------------------------------------------------------------------
def _reference(hidden_states, weight, *, top_k, norm_topk_prob, routed_scaling_factor):
    """Plain-JAX reference mirroring the PyTorch forward (greedy, eval)."""
    b, s, h = hidden_states.shape
    x = hidden_states.reshape(-1, h).astype(jnp.float32)
    logits = x @ weight.T.astype(jnp.float32)
    scores = jax.nn.softmax(logits, axis=-1)
    topk_w, topk_i = jax.lax.top_k(scores, top_k)
    if top_k > 1 and norm_topk_prob:
        topk_w = topk_w / (jnp.sum(topk_w, axis=-1, keepdims=True) + 1e-20)
    else:
        topk_w = topk_w * routed_scaling_factor
    return topk_i.astype(jnp.int32), topk_w


if __name__ == "__main__":
    # Small config consistent with the module
    bsz, seq_len, hidden_size = 2, 8, 32
    n_routed_experts = 8
    top_k = 2
    norm_topk_prob = True
    routed_scaling_factor = 1.0

    key = jax.random.PRNGKey(0)
    kx, kw = jax.random.split(key)

    hidden_states = jax.random.normal(kx, (bsz, seq_len, hidden_size),
                                      dtype=jnp.float32)

    # kaiming_uniform_(weight, a=sqrt(5)) -> U(-1/sqrt(fan_in), 1/sqrt(fan_in))
    bound = 1.0 / math.sqrt(hidden_size)
    weight = jax.random.uniform(kw, (n_routed_experts, hidden_size),
                                dtype=jnp.float32, minval=-bound, maxval=bound)

    topk_idx, topk_weight, aux_loss = moe_gate(
        hidden_states, weight, top_k=top_k, norm_topk_prob=norm_topk_prob,
        routed_scaling_factor=routed_scaling_factor)
    jax.block_until_ready((topk_idx, topk_weight))

    # correctness check vs plain JAX
    ref_idx, ref_w = _reference(
        hidden_states, weight, top_k=top_k, norm_topk_prob=norm_topk_prob,
        routed_scaling_factor=routed_scaling_factor)
    assert topk_idx.shape == (bsz * seq_len, top_k)
    assert topk_weight.shape == (bsz * seq_len, top_k)
    assert jnp.array_equal(jnp.sort(topk_idx, axis=-1), jnp.sort(ref_idx, axis=-1))
    assert jnp.allclose(jnp.sort(topk_weight, axis=-1),
                        jnp.sort(ref_w, axis=-1), atol=1e-5)
    assert aux_loss is None

    print("KERNEL_OK")
</pallas_src>

<mosaic_0001>
module attributes {stable_mosaic.version = 11 : i64} {
  func.func @_moe_gate_kernel(%arg0: i32, %arg1: memref<16x32xf32, #tpu.memory_space<vmem>>, %arg2: memref<32x8xf32, #tpu.memory_space<vmem>>, %arg3: memref<16x2xi32, #tpu.memory_space<vmem>>, %arg4: memref<16x2xf32, #tpu.memory_space<vmem>>) attributes {dimension_semantics = [#tpu.dimension_semantics<parallel>], iteration_bounds = array<i64: 1>, scalar_prefetch = 0 : i64, scratch_operands = 0 : i64, tpu.core_type = #tpu.core_type<tc>, window_params = [{transform_indices = @transform_0, window_bounds = array<i64: 16, 32>}, {pipeline_mode = #tpu.pipeline_mode<synchronous>, transform_indices = @transform_1, window_bounds = array<i64: 32, 8>}, {transform_indices = @transform_2, window_bounds = array<i64: 16, 2>}, {transform_indices = @transform_3, window_bounds = array<i64: 16, 2>}]} {
    %c0 = arith.constant 0 : index
    %c0_0 = arith.constant 0 : index
    %0 = vector.load %arg1[%c0, %c0_0] : memref<16x32xf32, #tpu.memory_space<vmem>>, vector<16x32xf32>
    %c0_1 = arith.constant 0 : index
    %c0_2 = arith.constant 0 : index
    %1 = vector.load %arg2[%c0_1, %c0_2] : memref<32x8xf32, #tpu.memory_space<vmem>>, vector<32x8xf32>
    %cst = arith.constant dense<0.000000e+00> : vector<16x8xf32>
    %2 = tpu.matmul %0, %1, %cst {dimension_numbers = #tpu.dot_dimension_numbers<[1], [0], [0], [1], [0, 0, 1, 1], [], []>} : vector<16x32xf32>, vector<32x8xf32>, vector<16x8xf32> -> vector<16x8xf32>
    %3 = tpu.iota {dimensions = array<i32: 1>} : vector<16x8xi32>
    %cst_3 = arith.constant dense<0xFF800000> : vector<16xf32>
    %4 = vector.multi_reduction <maximumf>, %2, %cst_3 [1] : vector<16x8xf32> to vector<16xf32>
    %5 = vector.shape_cast %4 : vector<16xf32> to vector<16x1xf32>
    %6 = vector.broadcast %5 : vector<16x1xf32> to vector<16x8xf32>
    %7 = arith.cmpf oeq, %2, %6 : vector<16x8xf32>
    %c8_i32 = arith.constant 8 : i32
    %8 = vector.broadcast %c8_i32 : i32 to vector<16x8xi32>
    %9 = arith.select %7, %3, %8 : vector<16x8xi1>, vector<16x8xi32>
    %cst_4 = arith.constant dense<2147483647> : vector<16xi32>
    %10 = vector.multi_reduction <minsi>, %9, %cst_4 [1] : vector<16x8xi32> to vector<16xi32>
    %11 = vector.shape_cast %10 : vector<16xi32> to vector<16x1xi32>
    %12 = vector.broadcast %11 : vector<16x1xi32> to vector<16x8xi32>
    %13 = arith.cmpi eq, %3, %12 : vector<16x8xi32>
    %cst_5 = arith.constant 0xFF800000 : f32
    %14 = vector.broadcast %cst_5 : f32 to vector<16x8xf32>
    %15 = arith.select %13, %14, %2 : vector<16x8xi1>, vector<16x8xf32>
    %cst_6 = arith.constant dense<0xFF800000> : vector<16xf32>
    %16 = vector.multi_reduction <maximumf>, %15, %cst_6 [1] : vector<16x8xf32> to vector<16xf32>
    %17 = vector.shape_cast %16 : vector<16xf32> to vector<16x1xf32>
    %18 = vector.broadcast %17 : vector<16x1xf32> to vector<16x8xf32>
    %19 = arith.cmpf oeq, %15, %18 : vector<16x8xf32>
    %c8_i32_7 = arith.constant 8 : i32
    %20 = vector.broadcast %c8_i32_7 : i32 to vector<16x8xi32>
    %21 = arith.select %19, %3, %20 : vector<16x8xi1>, vector<16x8xi32>
    %cst_8 = arith.constant dense<2147483647> : vector<16xi32>
    %22 = vector.multi_reduction <minsi>, %21, %cst_8 [1] : vector<16x8xi32> to vector<16xi32>
    %23 = vector.shape_cast %22 : vector<16xi32> to vector<16x1xi32>
    %24 = tpu.concatenate %5, %17 in 1 : vector<16x1xf32>, vector<16x1xf32> -> vector<16x2xf32>
    %25 = vector.broadcast %5 : vector<16x1xf32> to vector<16x2xf32>
    %26 = arith.subf %24, %25 : vector<16x2xf32>
    %27 = math.exp %26 : vector<16x2xf32>
    %cst_9 = arith.constant dense<0.000000e+00> : vector<16xf32>
    %28 = vector.multi_reduction <add>, %27, %cst_9 [1] : vector<16x2xf32> to vector<16xf32>
    %29 = vector.shape_cast %28 : vector<16xf32> to vector<16x1xf32>
    %cst_10 = arith.constant 9.99999968E-21 : f32
    %30 = vector.broadcast %cst_10 : f32 to vector<16x1xf32>
    %31 = arith.addf %29, %30 : vector<16x1xf32>
    %32 = vector.broadcast %31 : vector<16x1xf32> to vector<16x2xf32>
    %33 = arith.divf %27, %32 : vector<16x2xf32>
    %34 = tpu.concatenate %11, %23 in 1 : vector<16x1xi32>, vector<16x1xi32> -> vector<16x2xi32>
    %c0_11 = arith.constant 0 : index
    %c0_12 = arith.constant 0 : index
    %35 = vector.load %arg3[%c0_11, %c0_12] : memref<16x2xi32, #tpu.memory_space<vmem>>, vector<16x2xi32>
    tpu.vector_store %arg3[%c0_11, %c0_12], %34 {strides = array<i32>} : memref<16x2xi32, #tpu.memory_space<vmem>>, vector<16x2xi32>,
    %c0_13 = arith.constant 0 : index
    %c0_14 = arith.constant 0 : index
    %36 = vector.load %arg4[%c0_13, %c0_14] : memref<16x2xf32, #tpu.memory_space<vmem>>, vector<16x2xf32>
    tpu.vector_store %arg4[%c0_13, %c0_14], %33 {strides = array<i32>} : memref<16x2xf32, #tpu.memory_space<vmem>>, vector<16x2xf32>,
    return
  }
  func.func @transform_0(%arg0: i32) -> (i32, i32) {
    %c0_i32 = arith.constant 0 : i32
    %c0_i32_0 = arith.constant 0 : i32
    return %arg0, %c0_i32 : i32, i32
  }
  func.func @transform_1(%arg0: i32) -> (i32, i32) {
    %c0_i32 = arith.constant 0 : i32
    %c0_i32_0 = arith.constant 0 : i32
    %c0_i32_1 = arith.constant 0 : i32
    return %c0_i32, %c0_i32_0 : i32, i32
  }
  func.func @transform_2(%arg0: i32) -> (i32, i32) {
    %c0_i32 = arith.constant 0 : i32
    %c0_i32_0 = arith.constant 0 : i32
    return %arg0, %c0_i32 : i32, i32
  }
  func.func @transform_3(%arg0: i32) -> (i32, i32) {
    %c0_i32 = arith.constant 0 : i32
    %c0_i32_0 = arith.constant 0 : i32
    return %arg0, %c0_i32 : i32, i32
  }
}

</mosaic_0001>

<bundles_post_ra>
// kernel: tpu_custom_call.1
= control target key start
LH: loop header
LB: loop body
LE: loop exit
PB: predicated region body
PF: predicated region fallthrough
CT: control target
= control target key end

     0   :  { %vm19_vm0 = vcmask 261120   ;;  %vm103_vm1 = vcmask 64512   ;;  %v101_v12 = vlaneseq  ;;  %vm188_vm8 = vcmask 7168   ;;  %s335_s1 = inlined_call_operand.vmem [shape: f32[32,8], index: 1, kind: input, shape index: {}]   ;;  %s336_s0 = inlined_call_operand.vmem [shape: f32[16,32], index: 0, kind: input, shape index: {}]   ;;  %s337_s3 = inlined_call_operand.vmem [shape: f32[16,2], index: 3, kind: output, shape index: {1}]   ;;  %s338_s2 = inlined_call_operand.vmem [shape: s32[16,2], index: 2, kind: output, shape index: {0}]  }
   0x1   :  { %v15_v0 = vld [vmem:[%s335_s1] sm:$0xff]  ;;  %v16_v1 = vld [vmem:[%s335_s1 + $0x8] sm:$0xff]  ;;  %v17_v2 = vld [vmem:[%s335_s1 + $0x10] sm:$0xff]  ;;  %vm197_vm11 = vcmask 15360  }
   0x2   :  { %v243_v3 = vpack.c.bf16 %v16_v1, %v15_v0  ;;  %v18_v4 = vld [vmem:[%s335_s1 + $0x18] sm:$0xff]  ;;  %v13_v5 = vld [vmem:[%s336_s0] sm:$0xff]  ;;  %v14_v7 = vld [vmem:[%s336_s0 + $0x8] sm:$0xff]  ;;  %v102_v13 = vand.u32 127, %v101_v12 }
   0x3   :  { %v247_v6 = vpack.c.bf16 %v18_v4, %v17_v2  ;;  %240 = vmatprep.mubr.msk.f32.mxu0 %vm19_vm0, %v13_v5 }
   0x4   :  { %244 = vmatprep.subr.bf16.mxu0 %v243_v3 }
   0x5   :  { %246 = vmatpush3.bf16.msra.mxu0 %v243_v3 }
   0x6   :  { %248 = vmatprep.subr.bf16.mxu0 %v247_v6 }
   0x9   :  { %250 = vmatpush3.bf16.msra.mxu0 %v247_v6 }
   0xc   :  { %241 = vmatmul.mubr.msk.f32.vlgmr.msra.gmra.mrb[0].mxu0 %vm19_vm0, %v14_v7 }
  0xdf   :  { %v242_v8 = vpop.f32.mrb[0].mxu0 }
  0xe0   :  { %v92_v9 = vpop.f32.mrb[1].mxu0  ;;  %v107_v11 = vsel %vm103_vm1, %v242_v8, -inf }
  0xe1   :  { %v104_v10 = vsel %vm103_vm1, %v92_v9, -inf }
  0xe2   :  { %105 = vmax.xlane.f32.xlu0 %v104_v10 }
  0xe6   :  { %108 = vmax.xlane.f32.xlu0 %v107_v11 }
 0x16f   :  { %v106_v14 = vpop.xlane.xlu0 %105 }
 0x170   :  { %vm110_vm2 = vcmp.eq.f32.partialorder %v92_v9, %v106_v14 }
 0x171   :  { %v112_v15 = vsel %vm110_vm2, %v102_v13, 8 }
 0x172   :  { %v114_v16 = vsel %vm103_vm1, %v112_v15, 2147483647 }
 0x173   :  { %v109_v17 = vpop.xlane.xlu0 %108  ;;  %v116_v18 = vshra.s32 %v114_v16, 16  ;;  %v115_v24 = vand.u32 65535, %v114_v16 }
 0x174   :  { %vm111_vm3 = vcmp.eq.f32.partialorder %v242_v8, %v109_v17 }
 0x175   :  { %v118_v19 = vcvt.s32.f32 %v116_v18  ;;  %v113_v20 = vsel %vm111_vm3, %v102_v13, 8  ;;  %v117_v26 = vcvt.s32.f32 %v115_v24 }
 0x176   :  { %v129_v21 = vsel %vm103_vm1, %v113_v20, 2147483647 }
 0x177   :  { %119 = vmin.xlane.f32.xlu1 %v118_v19  ;;  %v131_v22 = vshra.s32 %v129_v21, 16  ;;  %v130_v27 = vand.u32 65535, %v129_v21 }
 0x179   :  { %v133_v23 = vcvt.s32.f32 %v131_v22  ;;  %v132_v30 = vcvt.s32.f32 %v130_v27 }
 0x17b   :  { %134 = vmin.xlane.f32.xlu1 %v133_v23 }
 0x204   :  { %v120_v25 = vpop.xlane.xlu1 %119 }
 0x205   :  { %vm121_vm4 = vcmp.eq.f32.partialorder %v118_v19, %v120_v25  ;;  %v126_v32 = vcvt.f32.s32 %v120_v25 }
 0x206   :  { %v122_v28 = vsel %vm121_vm4, %v117_v26, inf }
 0x207   :  { %123 = vmin.xlane.f32.xlu0 %v122_v28  ;;  %v127_v34 = vshll.u32 %v126_v32, 16 }
 0x208   :  { %v135_v29 = vpop.xlane.xlu1 %134 }
 0x209   :  { %vm136_vm5 = vcmp.eq.f32.partialorder %v133_v23, %v135_v29  ;;  %v141_v35 = vcvt.f32.s32 %v135_v29 }
 0x20a   :  { %v137_v31 = vsel %vm136_vm5, %v132_v30, inf }
 0x20b   :  { %138 = vmin.xlane.f32.xlu1 %v137_v31  ;;  %v142_v39 = vshll.u32 %v141_v35, 16 }
 0x294   :  { %v124_v33 = vpop.xlane.xlu0 %123 }
 0x295   :  { %v125_v36 = vcvt.f32.s32 %v124_v33 }
 0x297   :  { %v301_v37 = vadd.s32 %v127_v34, %v125_v36 }
 0x298   :  { %v139_v38 = vpop.xlane.xlu1 %138 }
 0x299   :  { %v140_v40 = vcvt.f32.s32 %v139_v38  ;;  %vm144_vm6 = vcmp.eq.s32.totalorder %v102_v13, %v301_v37 }
 0x29a   :  { %v146_v41 = vsel %vm144_vm6, -inf, %v92_v9 }
 0x29b   :  { %v304_v42 = vadd.s32 %v142_v39, %v140_v40  ;;  %v148_v43 = vsel %vm103_vm1, %v146_v41, -inf }
 0x29c   :  { %149 = vmax.xlane.f32.xlu0 %v148_v43 }
 0x29d   :  { %vm145_vm7 = vcmp.eq.s32.totalorder %v102_v13, %v304_v42 }
 0x29e   :  { %v147_v44 = vsel %vm145_vm7, -inf, %v242_v8 }
 0x29f   :  { %v151_v45 = vsel %vm103_vm1, %v147_v44, -inf }
 0x2a0   :  { %152 = vmax.xlane.f32.xlu1 %v151_v45 }
 0x329   :  { %v150_v46 = vpop.xlane.xlu0 %149 }
 0x32a   :  { %vm154_vm9 = vcmp.eq.f32.partialorder %v146_v41, %v150_v46  ;;  %v189_v47 = vsel %vm188_vm8, %v106_v14, %v150_v46 }
 0x32b   :  { %v156_v48 = vsel %vm154_vm9, %v102_v13, 8  ;;  %v191_v49 = vsub.f32 %v189_v47, %v106_v14 }
 0x32c   :  { %v158_v50 = vsel %vm103_vm1, %v156_v48, 2147483647 }
 0x32d   :  { %v193_v51 = vmul.f32 1.442695, %v191_v49  ;;  %v153_v52 = vpop.xlane.xlu1 %152  ;;  %v160_v53 = vshra.s32 %v158_v50, 16  ;;  %v159_v2 = vand.u32 65535, %v158_v50 }
 0x32e   :  { %vm155_vm10 = vcmp.eq.f32.partialorder %v147_v44, %v153_v52  ;;  %v190_v54 = vsel %vm188_vm8, %v109_v17, %v153_v52 }
 0x32f   :  { %251 = vpow2.f32 %v193_v51  ;;  %v157_v55 = vsel %vm155_vm10, %v102_v13, 8  ;;  %v192_v56 = vsub.f32 %v190_v54, %v109_v17  ;;  %v162_v57 = vcvt.s32.f32 %v160_v53 }
 0x330   :  { %v173_v58 = vsel %vm103_vm1, %v157_v55, 2147483647  ;;  %v161_v4 = vcvt.s32.f32 %v159_v2 }
 0x331   :  { %v195_v59 = vmul.f32 1.442695, %v192_v56  ;;  %163 = vmin.xlane.f32.xlu0 %v162_v57  ;;  %v175_v60 = vshra.s32 %v173_v58, 16  ;;  %v174_v5 = vand.u32 65535, %v173_v58 }
 0x333   :  { %253 = vpow2.f32 %v195_v59  ;;  %v177_v61 = vcvt.s32.f32 %v175_v60  ;;  %v176_v8 = vcvt.s32.f32 %v174_v5 }
 0x335   :  { %178 = vmin.xlane.f32.xlu1 %v177_v61 }
 0x339   :  { %v252_v62 = vpop.eup %251 }
 0x33a   :  { %v198_v63 = vsel %vm197_vm11, %v252_v62, 0.0 }
 0x33b   :  { %199 = vadd.xlane.f32.xlu0 %v198_v63 }
 0x33d   :  { %v254_v0 = vpop.eup %253 }
 0x33e   :  { %v201_v1 = vsel %vm197_vm11, %v254_v0, 0.0 }
 0x33f   :  { %202 = vadd.xlane.f32.xlu1 %v201_v1 }
 0x3be   :  { %v164_v3 = vpop.xlane.xlu0 %163 }
 0x3bf   :  { %vm165_vm12 = vcmp.eq.f32.partialorder %v162_v57, %v164_v3  ;;  %v170_v18 = vcvt.f32.s32 %v164_v3 }
 0x3c0   :  { %v166_v6 = vsel %vm165_vm12, %v161_v4, inf }
 0x3c1   :  { %167 = vmin.xlane.f32.xlu0 %v166_v6  ;;  %v171_v20 = vshll.u32 %v170_v18, 16 }
 0x3c2   :  { %v179_v7 = vpop.xlane.xlu1 %178 }
 0x3c3   :  { %vm180_vm13 = vcmp.eq.f32.partialorder %v177_v61, %v179_v7  ;;  %v185_v21 = vcvt.f32.s32 %v179_v7 }
 0x3c4   :  { %v181_v9 = vsel %vm180_vm13, %v176_v8, inf }
 0x3c5   :  { %182 = vmin.xlane.f32.xlu1 %v181_v9  ;;  %v186_v25 = vshll.u32 %v185_v21, 16 }
 0x3c8   :  { %v200_v10 = vpop.xlane.xlu0 %199 }
 0x3c9   :  { %v204_v11 = vadd.f32 1e-20, %v200_v10 }
 0x3cb   :  { %255 = vrcp.f32 %v204_v11 }
 0x3cc   :  { %v203_v12 = vpop.xlane.xlu1 %202 }
 0x3cd   :  { %v205_v13 = vadd.f32 1e-20, %v203_v12 }
 0x3cf   :  { %257 = vrcp.f32 %v205_v13 }
 0x3d5   :  { %v256_v14 = vpop.eup %255 }
 0x3d6   :  { %v207_v15 = vmul.f32 %v256_v14, %v252_v62 }
 0x3d8   :  { %214 = vst.msk [vmem:[%s337_s3] sm:$0xff] %vm197_vm11, %v207_v15 }
 0x3d9   :  { %v258_v16 = vpop.eup %257 }
 0x3da   :  { %v209_v17 = vmul.f32 %v258_v16, %v254_v0 }
 0x3dc   :  { %215 = vst.msk [vmem:[%s337_s3 + $0x8] sm:$0xff] %vm197_vm11, %v209_v17 }
 0x44e   :  { %v168_v19 = vpop.xlane.xlu0 %167 }
 0x44f   :  { %v169_v22 = vcvt.f32.s32 %v168_v19 }
 0x451   :  { %v172_v23 = vadd.s32 %v171_v20, %v169_v22 }
 0x452   :  { %v183_v24 = vpop.xlane.xlu1 %182 }
 0x453   :  { %v210_v26 = vsel %vm188_vm8, %v301_v37, %v172_v23  ;;  %v184_v27 = vcvt.f32.s32 %v183_v24 }
 0x454   :  { %212 = vst.msk [vmem:[%s338_s2] sm:$0xff] %vm197_vm11, %v210_v26 }
 0x455   :  { %v187_v28 = vadd.s32 %v186_v25, %v184_v27 }
 0x457   :  { %v211_v29 = vsel %vm188_vm8, %v304_v42, %v187_v28 }
 0x458   :  { %213 = vst.msk [vmem:[%s338_s2 + $0x8] sm:$0xff] %vm197_vm11, %v211_v29 }

</bundles_post_ra>
